<compile_context>
chip_gen: v7x
topology: tpu7x:2x2x1
jax: 0.10.0
libtpu: 0.0.40
codegen_flags: <defaults>
</compile_context>

<pallas_src>
import math
from functools import partial

import jax
import jax.numpy as jnp
from jax.experimental import pallas as pl
from jax.experimental.pallas import tpu as pltpu

_LANE = 128
_MAX_BLOCK_B = 512  # fatter tiles amortize per-step overhead; ~85% roofline @512


def _round_up(n, m):
    return ((n + m - 1) // m) * m


def _sublane(dtype):
    # sublane pack: 8 for 32-bit, 16 for 16-bit, 32 for 8-bit dtypes
    return {4: 8, 2: 16, 1: 32}.get(jnp.dtype(dtype).itemsize, 8)


def _pad_axis(a, target, axis):
    pad = target - a.shape[axis]
    if pad == 0:
        return a
    widths = [(0, 0)] * a.ndim
    widths[axis] = (0, pad)
    return jnp.pad(a, widths)


def _vmem_cap_bytes():
    """Generation-gated VMEM budget: ~7/8 of physical capacity
    (~112 MiB on v5e/v6e, ~56 MiB on v7x); safe 56 MiB fallback."""
    try:
        cap = int(pltpu.get_tpu_info().vmem_capacity_bytes)
    except Exception:
        cap = 64 * 2**20
    return (cap * 7) // 8


_VMEM_CAP = _vmem_cap_bytes()


def _gelu(x, approximate):
    if approximate:
        # tanh approximation -> transcendental goes to the EUP slot (frees VALU)
        return jax.nn.gelu(x, approximate=True)
    # exact erf formulation = PyTorch nn.GELU() default
    return 0.5 * x * (1.0 + jax.lax.erf(x * (1.0 / math.sqrt(2.0))))


def phi_kernel(x_ref, w1_ref, b1_ref, w2_ref, b2_ref, w3_ref, b3_ref, o_ref,
               *, approximate_gelu):
    # Operands in the weight dtype (bf16 weights -> fast MXU path); f32 accumulate.
    x = x_ref[...]
    if x.dtype != w1_ref.dtype:
        x = x.astype(w1_ref.dtype)

    # Layer 1: Linear + GELU (Dropout = identity at inference)
    h = jnp.dot(x, w1_ref[...], preferred_element_type=jnp.float32)
    h = _gelu(h + b1_ref[...].astype(jnp.float32), approximate_gelu)
    h = h.astype(w2_ref.dtype)

    # Layer 2: Linear + GELU (Dropout = identity at inference)
    h = jnp.dot(h, w2_ref[...], preferred_element_type=jnp.float32)
    h = _gelu(h + b2_ref[...].astype(jnp.float32), approximate_gelu)
    h = h.astype(w3_ref.dtype)

    # Layer 3: Linear
    out = jnp.dot(h, w3_ref[...], preferred_element_type=jnp.float32)
    out = out + b3_ref[...].astype(jnp.float32)
    o_ref[...] = out.astype(o_ref.dtype)


def pad_phi_params(w1, b1, w2, b2, w3, b3, dtype=None):
    """Pad parameters to lane-dense (multiple-of-128) feature dims ONCE.

    Call this at parameter-load time and reuse the result across forward calls
    (keeps the padding out of the per-call jitted graph).  `dtype` optionally
    casts the weights (e.g. jnp.bfloat16 for max MXU throughput on v6e/v7x).
    Returns (padded_params_tuple, out_dim).
    """
    if dtype is not None:
        w1, b1, w2, b2, w3, b3 = (a.astype(dtype) for a in (w1, b1, w2, b2, w3, b3))
    in_dim, hid_dim = w1.shape
    out_dim = w3.shape[1]
    in_p = _round_up(in_dim, _LANE)
    hid_p = _round_up(hid_dim, _LANE)
    out_p = _round_up(out_dim, _LANE)

    w1_p = _pad_axis(_pad_axis(w1, in_p, 0), hid_p, 1)
    b1_p = _pad_axis(jnp.reshape(b1, (1, -1)), hid_p, 1)
    w2_p = _pad_axis(_pad_axis(w2, hid_p, 0), hid_p, 1)
    b2_p = _pad_axis(jnp.reshape(b2, (1, -1)), hid_p, 1)
    w3_p = _pad_axis(_pad_axis(w3, hid_p, 0), out_p, 1)
    b3_p = _pad_axis(jnp.reshape(b3, (1, -1)), out_p, 1)
    return (w1_p, b1_p, w2_p, b2_p, w3_p, b3_p), out_dim


@partial(jax.jit, static_argnames=("out_dim", "block_b", "approximate_gelu"))
def phi_forward_padded(x, padded_params, *, out_dim, block_b=None,
                       approximate_gelu=False):
    """Fused Phi forward.  `padded_params` comes from pad_phi_params."""
    w1_p, b1_p, w2_p, b2_p, w3_p, b3_p = padded_params
    B, in_dim = x.shape
    in_p, hid_p = w1_p.shape
    out_p = w3_p.shape[1]

    sub = _sublane(x.dtype)

    # --- batch tile heuristic (megacore-aware) ------------------------------
    if block_b is None:
        if B <= sub:
            block_b = sub                       # single tiny tile
        else:
            # >= 2 "parallel" grid steps so both v7x TensorCores get work;
            # capped at 512 rows (big tiles amortize per-step overhead).
            block_b = min(_MAX_BLOCK_B, _round_up(-(-B // 2), sub))
    else:
        block_b = _round_up(block_b, sub)

    # --- VMEM budget (generation-gated) --------------------------------------
    w_item = jnp.dtype(w1_p.dtype).itemsize
    x_item = jnp.dtype(x.dtype).itemsize
    weight_bytes = (in_p * hid_p + hid_p * hid_p + hid_p * out_p
                    + 2 * hid_p + out_p) * w_item

    def _needed(bb):
        stream = bb * (2 * in_p * x_item + 2 * out_p * x_item)   # 2-deep x/out
        acts = bb * (2 * hid_p + out_p) * 4                       # f32 intermediates
        return int(1.25 * (weight_bytes + stream + acts))

    # Shrink the batch tile rather than spill if the footprint would not fit.
    while block_b > sub and _needed(block_b) > _VMEM_CAP:
        block_b = max(sub, _round_up(block_b // 2, sub))
    if _needed(block_b) > _VMEM_CAP:
        raise ValueError(
            f"Phi resident weights ({weight_bytes / 2**20:.1f} MiB padded) do not "
            f"fit the VMEM budget ({_VMEM_CAP / 2**20:.1f} MiB); hidden_dim too "
            "large for the fused kernel on this TPU generation. "
            "TODO(synk): tile the hidden dimension with an accumulator.")

    B_p = _round_up(B, block_b)
    grid = (B_p // block_b,)
    vmem_limit = int(min(max(_needed(block_b), 32 * 2**20), _VMEM_CAP))

    # Pad x only when actually needed (avoids an extra HBM pass).
    x_p = x
    if B_p != B or in_p != in_dim:
        x_p = _pad_axis(_pad_axis(x, B_p, 0), in_p, 1)

    resident = dict(pipeline_mode=pl.Buffered(1))  # constant index_map -> 1 buffer

    out_padded = pl.pallas_call(
        partial(phi_kernel, approximate_gelu=approximate_gelu),
        out_shape=jax.ShapeDtypeStruct((B_p, out_p), x.dtype),
        grid_spec=pltpu.PrefetchScalarGridSpec(
            num_scalar_prefetch=0,
            grid=grid,
            in_specs=[
                pl.BlockSpec((block_b, in_p), lambda i: (i, 0)),              # x tile
                pl.BlockSpec((in_p, hid_p), lambda i: (0, 0), **resident),    # W1
                pl.BlockSpec((1, hid_p), lambda i: (0, 0), **resident),       # b1
                pl.BlockSpec((hid_p, hid_p), lambda i: (0, 0), **resident),   # W2
                pl.BlockSpec((1, hid_p), lambda i: (0, 0), **resident),       # b2
                pl.BlockSpec((hid_p, out_p), lambda i: (0, 0), **resident),   # W3
                pl.BlockSpec((1, out_p), lambda i: (0, 0), **resident),       # b3
            ],
            out_specs=pl.BlockSpec((block_b, out_p), lambda i: (i, 0)),
        ),
        compiler_params=pltpu.CompilerParams(
            dimension_semantics=("parallel",),
            vmem_limit_bytes=vmem_limit,
        ),
    )(x_p, w1_p, b1_p, w2_p, b2_p, w3_p, b3_p)

    # Skip the slice copy when no padding was added.
    if B_p == B and out_p == out_dim:
        return out_padded
    return out_padded[:B, :out_dim]


def phi_forward(x, w1, b1, w2, b2, w3, b3, **kwargs):
    """Convenience one-shot wrapper (pads params per call; prefer
    pad_phi_params + phi_forward_padded in a real loop)."""
    padded_params, out_dim = pad_phi_params(w1, b1, w2, b2, w3, b3)
    return phi_forward_padded(x, padded_params, out_dim=out_dim, **kwargs)


def phi_reference(x, w1, b1, w2, b2, w3, b3, approximate_gelu=False):
    h = jax.nn.gelu(x @ w1 + b1, approximate=approximate_gelu)
    h = jax.nn.gelu(h @ w2 + b2, approximate=approximate_gelu)
    return h @ w3 + b3


def init_phi_params(key, input_dim, hidden_dim, output_dim, dtype=jnp.float32):
    """Deterministic init mimicking nn.Linear (uniform +/- 1/sqrt(fan_in)).
    Weights stored as (in_features, out_features) for direct x @ W."""
    ks = jax.random.split(key, 6)

    def linear(kw, kb, fan_in, fan_out):
        bound = 1.0 / math.sqrt(fan_in)
        w = jax.random.uniform(kw, (fan_in, fan_out), dtype, -bound, bound)
        b = jax.random.uniform(kb, (fan_out,), dtype, -bound, bound)
        return w, b

    w1, b1 = linear(ks[0], ks[1], input_dim, hidden_dim)
    w2, b2 = linear(ks[2], ks[3], hidden_dim, hidden_dim)
    w3, b3 = linear(ks[4], ks[5], hidden_dim, output_dim)
    return w1, b1, w2, b2, w3, b3


if __name__ == "__main__":
    # Small shapes consistent with the module's forward: x is (batch, input_dim).
    batch, input_dim, hidden_dim, output_dim = 16, 32, 64, 32

    key = jax.random.PRNGKey(0)
    kx, kp = jax.random.split(key)

    x = jax.random.normal(kx, (batch, input_dim), dtype=jnp.float32)
    w1, b1, w2, b2, w3, b3 = init_phi_params(kp, input_dim, hidden_dim, output_dim)

    # Pad parameters ONCE (outside the jitted forward) and reuse them.
    padded_params, out_dim = pad_phi_params(w1, b1, w2, b2, w3, b3)

    # 1) Exact-erf GELU (nn.GELU() default), batch split across >= 2 grid steps.
    out = jax.block_until_ready(phi_forward_padded(x, padded_params, out_dim=out_dim))
    ref = phi_reference(x, w1, b1, w2, b2, w3, b3)
    assert out.shape == (batch, output_dim)
    assert jnp.allclose(out, ref, atol=5e-5, rtol=1e-5), (
        f"max abs err = {jnp.max(jnp.abs(out - ref))}")

    # 2) Batch that is not a multiple of the sublane / tile size (padding path).
    x2 = jax.random.normal(kx, (30, input_dim), dtype=jnp.float32)
    out2 = jax.block_until_ready(phi_forward_padded(x2, padded_params, out_dim=out_dim))
    ref2 = phi_reference(x2, w1, b1, w2, b2, w3, b3)
    assert out2.shape == (30, output_dim)
    assert jnp.allclose(out2, ref2, atol=5e-5, rtol=1e-5), (
        f"max abs err (padded batch) = {jnp.max(jnp.abs(out2 - ref2))}")

    # 3) tanh-approximate GELU path (EUP) against the matching JAX reference.
    out3 = jax.block_until_ready(
        phi_forward_padded(x, padded_params, out_dim=out_dim, approximate_gelu=True))
    ref3 = phi_reference(x, w1, b1, w2, b2, w3, b3, approximate_gelu=True)
    assert jnp.allclose(out3, ref3, atol=5e-5, rtol=1e-5), (
        f"max abs err (tanh gelu) = {jnp.max(jnp.abs(out3 - ref3))}")

    print("KERNEL_OK")
</pallas_src>

<mosaic_0001>
module attributes {stable_mosaic.version = 11 : i64} {
  func.func @phi_kernel(%arg0: i32, %arg1: memref<8x128xf32, #tpu.memory_space<vmem>>, %arg2: memref<128x128xf32, #tpu.memory_space<vmem>>, %arg3: memref<1x128xf32, #tpu.memory_space<vmem>>, %arg4: memref<128x128xf32, #tpu.memory_space<vmem>>, %arg5: memref<1x128xf32, #tpu.memory_space<vmem>>, %arg6: memref<128x128xf32, #tpu.memory_space<vmem>>, %arg7: memref<1x128xf32, #tpu.memory_space<vmem>>, %arg8: memref<8x128xf32, #tpu.memory_space<vmem>>) attributes {dimension_semantics = [#tpu.dimension_semantics<parallel>], iteration_bounds = array<i64: 2>, scalar_prefetch = 0 : i64, scratch_operands = 0 : i64, tpu.core_type = #tpu.core_type<tc>, window_params = [{transform_indices = @transform_0, window_bounds = array<i64: 8, 128>}, {pipeline_mode = #tpu.pipeline_mode<synchronous>, transform_indices = @transform_1, window_bounds = array<i64: 128, 128>}, {pipeline_mode = #tpu.pipeline_mode<synchronous>, transform_indices = @transform_2, window_bounds = array<i64: 1, 128>}, {pipeline_mode = #tpu.pipeline_mode<synchronous>, transform_indices = @transform_3, window_bounds = array<i64: 128, 128>}, {pipeline_mode = #tpu.pipeline_mode<synchronous>, transform_indices = @transform_4, window_bounds = array<i64: 1, 128>}, {pipeline_mode = #tpu.pipeline_mode<synchronous>, transform_indices = @transform_5, window_bounds = array<i64: 128, 128>}, {pipeline_mode = #tpu.pipeline_mode<synchronous>, transform_indices = @transform_6, window_bounds = array<i64: 1, 128>}, {transform_indices = @transform_7, window_bounds = array<i64: 8, 128>}]} {
    %c0 = arith.constant 0 : index
    %c0_0 = arith.constant 0 : index
    %0 = vector.load %arg1[%c0, %c0_0] : memref<8x128xf32, #tpu.memory_space<vmem>>, vector<8x128xf32>
    %c0_1 = arith.constant 0 : index
    %c0_2 = arith.constant 0 : index
    %1 = vector.load %arg2[%c0_1, %c0_2] : memref<128x128xf32, #tpu.memory_space<vmem>>, vector<128x128xf32>
    %cst = arith.constant dense<0.000000e+00> : vector<8x128xf32>
    %2 = tpu.matmul %0, %1, %cst {dimension_numbers = #tpu.dot_dimension_numbers<[1], [0], [0], [1], [0, 0, 1, 1], [], []>} : vector<8x128xf32>, vector<128x128xf32>, vector<8x128xf32> -> vector<8x128xf32>
    %c0_3 = arith.constant 0 : index
    %c0_4 = arith.constant 0 : index
    %3 = vector.load %arg3[%c0_3, %c0_4] : memref<1x128xf32, #tpu.memory_space<vmem>>, vector<1x128xf32>
    %4 = vector.broadcast %3 : vector<1x128xf32> to vector<8x128xf32>
    %5 = arith.addf %2, %4 : vector<8x128xf32>
    %cst_5 = arith.constant 5.000000e-01 : f32
    %6 = vector.broadcast %cst_5 : f32 to vector<8x128xf32>
    %7 = arith.mulf %6, %5 : vector<8x128xf32>
    %cst_6 = arith.constant 0.707106769 : f32
    %8 = vector.broadcast %cst_6 : f32 to vector<8x128xf32>
    %9 = arith.mulf %5, %8 : vector<8x128xf32>
    %10 = math.erf %9 : vector<8x128xf32>
    %cst_7 = arith.constant 1.000000e+00 : f32
    %11 = vector.broadcast %cst_7 : f32 to vector<8x128xf32>
    %12 = arith.addf %11, %10 : vector<8x128xf32>
    %13 = arith.mulf %7, %12 : vector<8x128xf32>
    %c0_8 = arith.constant 0 : index
    %c0_9 = arith.constant 0 : index
    %14 = vector.load %arg4[%c0_8, %c0_9] : memref<128x128xf32, #tpu.memory_space<vmem>>, vector<128x128xf32>
    %cst_10 = arith.constant dense<0.000000e+00> : vector<8x128xf32>
    %15 = tpu.matmul %13, %14, %cst_10 {dimension_numbers = #tpu.dot_dimension_numbers<[1], [0], [0], [1], [0, 0, 1, 1], [], []>} : vector<8x128xf32>, vector<128x128xf32>, vector<8x128xf32> -> vector<8x128xf32>
    %c0_11 = arith.constant 0 : index
    %c0_12 = arith.constant 0 : index
    %16 = vector.load %arg5[%c0_11, %c0_12] : memref<1x128xf32, #tpu.memory_space<vmem>>, vector<1x128xf32>
    %17 = vector.broadcast %16 : vector<1x128xf32> to vector<8x128xf32>
    %18 = arith.addf %15, %17 : vector<8x128xf32>
    %cst_13 = arith.constant 5.000000e-01 : f32
    %19 = vector.broadcast %cst_13 : f32 to vector<8x128xf32>
    %20 = arith.mulf %19, %18 : vector<8x128xf32>
    %cst_14 = arith.constant 0.707106769 : f32
    %21 = vector.broadcast %cst_14 : f32 to vector<8x128xf32>
    %22 = arith.mulf %18, %21 : vector<8x128xf32>
    %23 = math.erf %22 : vector<8x128xf32>
    %cst_15 = arith.constant 1.000000e+00 : f32
    %24 = vector.broadcast %cst_15 : f32 to vector<8x128xf32>
    %25 = arith.addf %24, %23 : vector<8x128xf32>
    %26 = arith.mulf %20, %25 : vector<8x128xf32>
    %c0_16 = arith.constant 0 : index
    %c0_17 = arith.constant 0 : index
    %27 = vector.load %arg6[%c0_16, %c0_17] : memref<128x128xf32, #tpu.memory_space<vmem>>, vector<128x128xf32>
    %cst_18 = arith.constant dense<0.000000e+00> : vector<8x128xf32>
    %28 = tpu.matmul %26, %27, %cst_18 {dimension_numbers = #tpu.dot_dimension_numbers<[1], [0], [0], [1], [0, 0, 1, 1], [], []>} : vector<8x128xf32>, vector<128x128xf32>, vector<8x128xf32> -> vector<8x128xf32>
    %c0_19 = arith.constant 0 : index
    %c0_20 = arith.constant 0 : index
    %29 = vector.load %arg7[%c0_19, %c0_20] : memref<1x128xf32, #tpu.memory_space<vmem>>, vector<1x128xf32>
    %30 = vector.broadcast %29 : vector<1x128xf32> to vector<8x128xf32>
    %31 = arith.addf %28, %30 : vector<8x128xf32>
    %c0_21 = arith.constant 0 : index
    %c0_22 = arith.constant 0 : index
    %32 = vector.load %arg8[%c0_21, %c0_22] : memref<8x128xf32, #tpu.memory_space<vmem>>, vector<8x128xf32>
    tpu.vector_store %arg8[%c0_21, %c0_22], %31 {strides = array<i32>} : memref<8x128xf32, #tpu.memory_space<vmem>>, vector<8x128xf32>,
    return
  }
  func.func @transform_0(%arg0: i32) -> (i32, i32) {
    %c0_i32 = arith.constant 0 : i32
    %c0_i32_0 = arith.constant 0 : i32
    return %arg0, %c0_i32 : i32, i32
  }
  func.func @transform_1(%arg0: i32) -> (i32, i32) {
    %c0_i32 = arith.constant 0 : i32
    %c0_i32_0 = arith.constant 0 : i32
    %c0_i32_1 = arith.constant 0 : i32
    return %c0_i32, %c0_i32_0 : i32, i32
  }
  func.func @transform_2(%arg0: i32) -> (i32, i32) {
    %c0_i32 = arith.constant 0 : i32
    %c0_i32_0 = arith.constant 0 : i32
    %c0_i32_1 = arith.constant 0 : i32
    return %c0_i32, %c0_i32_0 : i32, i32
  }
  func.func @transform_3(%arg0: i32) -> (i32, i32) {
    %c0_i32 = arith.constant 0 : i32
    %c0_i32_0 = arith.constant 0 : i32
    %c0_i32_1 = arith.constant 0 : i32
    return %c0_i32, %c0_i32_0 : i32, i32
  }
  func.func @transform_4(%arg0: i32) -> (i32, i32) {
    %c0_i32 = arith.constant 0 : i32
    %c0_i32_0 = arith.constant 0 : i32
    %c0_i32_1 = arith.constant 0 : i32
    return %c0_i32, %c0_i32_0 : i32, i32
  }
  func.func @transform_5(%arg0: i32) -> (i32, i32) {
    %c0_i32 = arith.constant 0 : i32
    %c0_i32_0 = arith.constant 0 : i32
    %c0_i32_1 = arith.constant 0 : i32
    return %c0_i32, %c0_i32_0 : i32, i32
  }
  func.func @transform_6(%arg0: i32) -> (i32, i32) {
    %c0_i32 = arith.constant 0 : i32
    %c0_i32_0 = arith.constant 0 : i32
    %c0_i32_1 = arith.constant 0 : i32
    return %c0_i32, %c0_i32_0 : i32, i32
  }
  func.func @transform_7(%arg0: i32) -> (i32, i32) {
    %c0_i32 = arith.constant 0 : i32
    %c0_i32_0 = arith.constant 0 : i32
    return %arg0, %c0_i32 : i32, i32
  }
}

</mosaic_0001>

<bundles_post_ra>
// kernel: phi_forward_padded.1
= control target key start
LH: loop header
LB: loop body
LE: loop exit
PB: predicated region body
PF: predicated region fallthrough
CT: control target
= control target key end

     0   :  { %12 = vsyncpa [#allocation3], 0  ;;  %s1492_s0 = inlined_call_operand.vmem [shape: f32[16,128], index: 0, kind: input, shape index: {}]   ;;  %s1493_s1 = inlined_call_operand.hbm [shape: f32[128,128], index: 1, kind: input, shape index: {}]   ;;  %s1494_s2 = inlined_call_operand.vmem [shape: f32[1,128], index: 2, kind: input, shape index: {}]   ;;  %s1495_s3 = inlined_call_operand.hbm [shape: f32[128,128], index: 3, kind: input, shape index: {}]   ;;  %s1496_s4 = inlined_call_operand.vmem [shape: f32[1,128], index: 4, kind: input, shape index: {}]   ;;  %s1497_s5 = inlined_call_operand.hbm [shape: f32[128,128], index: 5, kind: input, shape index: {}]   ;;  %s1498_s6 = inlined_call_operand.vmem [shape: f32[1,128], index: 6, kind: input, shape index: {}]   ;;  %s1499_s7 = inlined_call_operand.hbm [shape: f32[16,128], index: 7, kind: output, shape index: {}]  }
   0x1   :  { %13 = vsyncpa [#allocation6], 0 }
   0x2   :  { %14 = vsyncpa [#allocation4], 0 }
   0x3   :  { %16 = vsyncpa [#allocation4 + $0x1], 0  ;;  %s1244_s24 = smov 0   ;;  %s1246_s25 = smov 0  }
   0x4   :  { %s1248_s26 = smov 0   ;;  %s1250_s27 = smov 0  }
   0x5 LB: > { %1506 = sst [smem:[#allocation12_spill]] %s1189_s26  ;;  %s1265_s28 = sadd.s32 4294967295, %s1193_s27   ;;  %s1193_s27 = sphi %s1250_s27, %s1521_s27   ;;  %s1189_s26 = sphi %s1248_s26, %s1523_s26   ;;  %s1185_s25 = sphi %s1246_s25, %s1525_s25   ;;  %s1181_s24 = sphi %s1244_s24, %s1524_s24  }
   0x6   : > { %s713_s29 = sadd.s32 4294967294, %s1193_s27   ;;  %s1269_s30 = sadd.s32 1, %s1193_s27  }
   0x7   : > { %1507 = sst [smem:[#allocation13_spill]] %s1269_s30  ;;  %s181_s8 = sadd.s32 1, %s1189_s26 }
   0x8   : > { %s178_s9 = ssub.s32 %s1193_s27, %s1269_s30  ;;  %p191_p0 = scmp.ne.s32.totalorder %s1189_s26, %s1185_s25 }
   0x9   : > { %p179_p1 = scmp.eq.s32.totalorder %s178_s9, 0  ;;  %p192_p2 = scmp.eq.s32.totalorder %s1265_s28, 1 }
   0xa   : > { %p197_p3 = scmp.ne.s32.totalorder %s1185_s25, %s1181_s24  ;;  %p198_p4 = scmp.eq.s32.totalorder %s713_s29, 1 }
   0xb   : > { %s1280_s10 = scalar_select %p179_p1, %s1189_s26, %s181_s8  }
   0xc   : > { %p1282_p5 = por %p192_p2, %p191_p0  ;;  %p1286_p6 = por %p198_p4, %p197_p3 }
   0xd   : > { %1508 = sst [smem:[#allocation14_spill]] %s1280_s10  ;;  %p714_p7 = scmp.ge.s32.totalorder %s1193_s27, 1 }
   0xe   : > { %s1509_s11 = scalar_select %p1282_p5, 1, 0 }
   0xf   : > { %s1510_s12 = scalar_select %p1286_p6, 1, 0 }
  0x10   : > { %p205_p8 = scmp.lt.s32.totalorder %s1193_s27, 3  ;;  %p1500_p9 = scmp.eq.s32.totalorder %s1265_s28, 0 }
  0x11   : > { %s1195_s14 = smov [#allocation5]   ;;  %s1196_s17 = smov [#allocation2]  }
  0x12   : > { %p1293_p10 = pnand %p714_p7, %p205_p8  ;;  %s233_s15 = sshll.u32 %s1195_s14, 4  ;;  %s1299_s15 = int_to_ptr.vmem [resolvable:$true] %s233_s15 }
  0x13   : > { %s217_s18 = sshll.u32 %s1196_s17, 4  ;;  %s1197_s19 = smov [#allocation7]   ;;  %s1307_s18 = int_to_ptr.vmem [resolvable:$true] %s217_s18 }
  0x14   : > { %s1511_s13 = scalar_select %p1293_p10, 1, 0 }
  0x15   : > { %p974_p11 = pneg %p1293_p10  ;;  %s1309_s20 = sshll.u32 %s1197_s19, 4  ;;  %s250_s20 = int_to_ptr.vmem [resolvable:$true] %s1309_s20 }
  0x16   : > { %s1039_s23 = scalar_lea.hbm %s1495_s3, 2048 }
  0x17   : > { %p1303_p12 = pnand %p1500_p9, %p974_p11  ;;  %p1040_p13 = scmp.ne.s32.totalorder %s1495_s3, %s1039_s23 }
  0x18   : > { %p1046_p3 = scmp.lt.u32.totalorder %s1039_s23, %s1495_s3 }
  0x19   : > { %p1319_p0 = pneg %p1303_p12 }
  0x1b   : > { %p1042_p1 = pnand %p1319_p0, %p1040_p13 }
  0x1d   : > { %p1043_p2 = pneg %p1042_p1 }
  0x1f   : > { %p1048_p4 = pnand %p1046_p3, %p1043_p2 }
  0x21   : > { %1051 = shalt.err (!%p1048_p4)
}
  0x22   : > { %s1052_s19 = scalar_lea.vmem %s1299_s15, 2048  ;;  %p1060_p9 = scmp.lt.s32.totalorder %s1299_s15, %s1299_s15 }
  0x23   : > { %p1053_p7 = scmp.ne.s32.totalorder %s1299_s15, %s1052_s19  ;;  %p1061_p6 = scmp.lt.s32.totalorder %s1052_s19, %s1052_s19 }
  0x25   : > { %p1055_p8 = pnand %p1053_p7, %p1319_p0  ;;  %p1062_p13 = por %p1061_p6, %p1060_p9 }
  0x27   : > { %p1056_p11 = pneg %p1055_p8 }
  0x29   : > { %p1063_p1 = pnand %p1062_p13, %p1056_p11 }
  0x2b   : > { %1066 = shalt.err (!%p1063_p1)
}
  0x2c   : > { %s1198_s21 = smov 128   ;;  %s1199_s22 = smov 8  }
  0x2d   : > { %980 = dma.hbm_to_vmem [thread:$0]  (!%p1303_p12), %s1495_s3, 2048, %s1299_s15, [#allocation6], %s1198_s21, %s1198_s21, %s1199_s22  }
  0x2e   : > { %s1067_s17 = scalar_lea.hbm %s1493_s1, 2048 }
  0x2f   : > { %p1068_p6 = scmp.ne.s32.totalorder %s1493_s1, %s1067_s17  ;;  %p1074_p3 = scmp.lt.u32.totalorder %s1067_s17, %s1493_s1 }
  0x31   : > { %p1070_p9 = pnand %p1068_p6, %p1319_p0 }
  0x33   : > { %p1071_p2 = pneg %p1070_p9 }
  0x35   : > { %p1076_p4 = pnand %p1074_p3, %p1071_p2 }
  0x37   : > { %1079 = shalt.err (!%p1076_p4)
}
  0x38   : > { %s1080_s15 = scalar_lea.vmem %s1307_s18, 2048  ;;  %p1088_p13 = scmp.lt.s32.totalorder %s1307_s18, %s1307_s18 }
  0x39   : > { %p1081_p7 = scmp.ne.s32.totalorder %s1307_s18, %s1080_s15  ;;  %p1089_p1 = scmp.lt.s32.totalorder %s1080_s15, %s1080_s15 }
  0x3b   : > { %p1083_p8 = pnand %p1081_p7, %p1319_p0  ;;  %p1090_p6 = por %p1089_p1, %p1088_p13 }
  0x3d   : > { %p1084_p11 = pneg %p1083_p8 }
  0x3f   : > { %p1091_p9 = pnand %p1090_p6, %p1084_p11 }
  0x41   : > { %1094 = shalt.err (!%p1091_p9)
}
  0x42   : > { %977 = dma.hbm_to_vmem [thread:$0]  (!%p1303_p12), %s1493_s1, 2048, %s1307_s18, [#allocation3], %s1198_s21, %s1198_s21, %s1199_s22  }
  0x43   : > { %s1095_s29 = scalar_lea.hbm %s1497_s5, 2048 }
  0x44   : > { %p1096_p2 = scmp.ne.s32.totalorder %s1497_s5, %s1095_s29  ;;  %p1102_p7 = scmp.lt.u32.totalorder %s1095_s29, %s1497_s5 }
  0x46   : > { %p1098_p3 = pnand %p1096_p2, %p1319_p0 }
  0x48   : > { %p1099_p4 = pneg %p1098_p3 }
  0x4a   : > { %p1104_p8 = pnand %p1102_p7, %p1099_p4 }
  0x4c   : > { %1107 = shalt.err (!%p1104_p8)
}
  0x4d   : > { %s1108_s15 = scalar_lea.vmem %s250_s20, 2048  ;;  %p1116_p6 = scmp.lt.s32.totalorder %s250_s20, %s250_s20 }
  0x4e   : > { %p1109_p11 = scmp.ne.s32.totalorder %s250_s20, %s1108_s15  ;;  %p1117_p9 = scmp.lt.s32.totalorder %s1108_s15, %s1108_s15 }
  0x50   : > { %p1111_p13 = pnand %p1109_p11, %p1319_p0  ;;  %p1118_p5 = por %p1117_p9, %p1116_p6 }
  0x52   : > { %p1112_p1 = pneg %p1111_p13 }
  0x54   : > { %p1119_p10 = pnand %p1118_p5, %p1112_p1 }
  0x56   : > { %1122 = shalt.err (!%p1119_p10)
}
  0x57   : > { %983 = dma.hbm_to_vmem [thread:$0]  (!%p1303_p12), %s1497_s5, 2048, %s250_s20, [#allocation6], %s1198_s21, %s1198_s21, %s1199_s22  }
  0x58   : > { %p1514_p2 = scmp.ne.s32.totalorder %s1511_s13, 0 }
  0x59   : > { %p1515_p0 = scmp.eq.s32.totalorder (!%p1514_p2), %s1265_s28, 0 }
  0x5a   : > { %275 = sbr.rel (%p1514_p2) target bundleno = 825 (0x339), region = 48 }
  0x61   : > { %1168 = dma.done.wait (%p1515_p0), [#allocation3], 2048   ;;  %p1516_p3 = pmov %p1515_p0 }
  0x62   : > { %p1517_p5 = pmov %p1515_p0 }
  0x63   : > { %1170 = vsyncadd (%p1516_p3), [#allocation3], 4294965248 }
  0x64   : > { %1172 = dma.done.wait (%p1517_p5), [#allocation6], 4096   ;;  %p1518_p10 = pmov %p1515_p0 }
  0x65   : > { %v1200_v0 = vmov 0.0|0.0   ;;  %vm1201_vm0 = vmmov 0   ;;  %v1202_v1 = vmov 0.0   ;;  %v319_v2 = vld [vmem:[#allocation2] sm:$0xff]  ;;  %v320_v3 = vld [vmem:[#allocation2 + $0x8] sm:$0xff]  ;;  %v321_v4 = vld [vmem:[#allocation2 + $0x10] sm:$0xff] }
  0x66   : > { %1174 = vsyncadd (%p1518_p10), [#allocation6], 4294963200  ;;  %888 = vmatprep.subr.bf16.mxu0 %v1200_v0  ;;  %815 = vmatprep.mubr.msk.f32.mxu0 %vm1201_vm0, %v1202_v1  ;;  %v889_v5 = vpack.c.bf16 %v320_v3, %v319_v2  ;;  %v322_v6 = vld [vmem:[#allocation2 + $0x18] sm:$0xff]  ;;  %v323_v8 = vld [vmem:[#allocation2 + $0x20] sm:$0xff]  ;;  %p314_p12 = scmp.lt.s32.totalorder %s1265_s28, 1  ;;  %s311_s29 = sand.u32 1, %s1185_s25  }
  0x67   : > { %912 = vmatprep.subr.bf16.mxu1 %v1200_v0  ;;  %850 = vmatprep.mubr.msk.f32.mxu1 %vm1201_vm0, %v1202_v1  ;;  %v892_v7 = vpack.c.bf16 %v322_v6, %v321_v4  ;;  %v324_v9 = vld [vmem:[#allocation2 + $0x28] sm:$0xff]  ;;  %v417_v10 = vld [vmem:[#allocation5] sm:$0xff]  ;;  %v419_v12 = vld [vmem:[#allocation5 + $0x10] sm:$0xff]  ;;  %s723_s8 = sshll.u32 %s311_s29, 3  ;;  %s729_s19 = sshll.u32 %s1265_s28, 7 }
  0x68   : > { %890 = vmatpush3.bf16.msra.mxu0 %v889_v5  ;;  %v418_v11 = vld [vmem:[#allocation5 + $0x8] sm:$0xff]  ;;  %v420_v13 = vld [vmem:[#allocation5 + $0x18] sm:$0xff]  ;;  %v895_v14 = vpack.c.bf16 %v324_v9, %v323_v8  ;;  %v325_v16 = vld [vmem:[#allocation2 + $0x30] sm:$0xff]  ;;  %s315_s13 = scalar_select %p314_p12, %s1265_s28, 1 }
  0x69   : > { %891 = vmatprep.subr.bf16.mxu0 %v1200_v0  ;;  %v913_v15 = vpack.c.bf16 %v418_v11, %v417_v10  ;;  %v326_v17 = vld [vmem:[#allocation2 + $0x38] sm:$0xff]  ;;  %v916_v18 = vpack.c.bf16 %v420_v13, %v419_v12  ;;  %v421_v19 = vld [vmem:[#allocation5 + $0x20] sm:$0xff]  ;;  %v422_v20 = vld [vmem:[#allocation5 + $0x28] sm:$0xff]  ;;  %s313_s15 = scalar_lea.vmem [#allocation8], %s723_s8  ;;  %s610_s20 = scalar_lea.sflag [#allocation4], %s311_s29 }
  0x6a   : > { %v898_v21 = vpack.c.bf16 %v326_v17, %v325_v16  ;;  %v327_v22 = vld [vmem:[#allocation2 + $0x40] sm:$0xff]  ;;  %v328_v23 = vld [vmem:[#allocation2 + $0x48] sm:$0xff]  ;;  %v919_v24 = vpack.c.bf16 %v422_v20, %v421_v19  ;;  %v329_v26 = vld [vmem:[#allocation2 + $0x50] sm:$0xff]  ;;  %s724_s16 = sshll.u32 %s315_s13, 3  ;;  %s623_s18 = sshll.u32 %s313_s15, 4  ;;  %s1452_s18 = int_to_ptr.vmem [resolvable:$true] %s623_s18 }
  0x6b   : > { %914 = vmatpush3.bf16.msra.mxu1 %v913_v15  ;;  %v901_v25 = vpack.c.bf16 %v328_v23, %v327_v22  ;;  %v330_v27 = vld [vmem:[#allocation2 + $0x58] sm:$0xff]  ;;  %v331_v29 = vld [vmem:[#allocation2 + $0x60] sm:$0xff]  ;;  %v332_v30 = vld [vmem:[#allocation2 + $0x68] sm:$0xff]  ;;  %s317_s21 = scalar_lea.vmem %s1492_s0, %s724_s16  ;;  %s1450_s16 = scalar_lea.hbm %s1499_s7, %s729_s19 }
  0x6c   : > { %893 = vmatpush3.bf16.msra.mxu0 %v892_v7  ;;  %915 = vmatprep.subr.bf16.mxu1 %v1200_v0  ;;  %v904_v28 = vpack.c.bf16 %v330_v27, %v329_v26  ;;  %v907_v31 = vpack.c.bf16 %v332_v30, %v331_v29  ;;  %v333_v32 = vld [vmem:[#allocation2 + $0x70] sm:$0xff]  ;;  %v334_v33 = vld [vmem:[#allocation2 + $0x78] sm:$0xff]  ;;  %v318_v35 = vld [vmem:[%s317_s21] sm:$0xff]  ;;  %s1123_s9 = scalar_lea.vmem %s1452_s18, 128  ;;  %p1519_p7 = scmp.ne.s32.totalorder %s1509_s11, 0 }
  0x6d   : > { %894 = vmatprep.subr.bf16.mxu0 %v1200_v0  ;;  %v910_v34 = vpack.c.bf16 %v334_v33, %v333_v32  ;;  %v423_v36 = vld [vmem:[#allocation5 + $0x30] sm:$0xff]  ;;  %v424_v37 = vld [vmem:[#allocation5 + $0x38] sm:$0xff]  ;;  %v425_v39 = vld [vmem:[#allocation5 + $0x40] sm:$0xff]  ;;  %p1124_p4 = scmp.ne.s32.totalorder %s1452_s18, %s1123_s9  ;;  %s1203_s28 = smov [#allocation8]  }
  0x6e   : > { %v922_v38 = vpack.c.bf16 %v424_v37, %v423_v36  ;;  %v426_v40 = vld [vmem:[#allocation5 + $0x48] sm:$0xff]  ;;  %v427_v42 = vld [vmem:[#allocation5 + $0x50] sm:$0xff]  ;;  %v428_v43 = vld [vmem:[#allocation5 + $0x58] sm:$0xff]  ;;  %s1127_s21 = sshll.u32 %s1203_s28, 4  ;;  %s1128_s21 = int_to_ptr.vmem [resolvable:$false] %s1127_s21 }
  0x6f   : > { %917 = vmatpush3.bf16.msra.mxu1 %v916_v18  ;;  %v925_v41 = vpack.c.bf16 %v426_v40, %v425_v39  ;;  %v928_v44 = vpack.c.bf16 %v428_v43, %v427_v42  ;;  %v429_v45 = vld [vmem:[#allocation5 + $0x60] sm:$0xff]  ;;  %v430_v46 = vld [vmem:[#allocation5 + $0x68] sm:$0xff]  ;;  %v431_v48 = vld [vmem:[#allocation5 + $0x70] sm:$0xff]  ;;  %p1125_p8 = pnand %p1124_p4, %p1519_p7  ;;  %s1129_s22 = scalar_lea.vmem %s1128_s21, 256 }
  0x70   : > { %896 = vmatpush3.bf16.msra.mxu0 %v895_v14  ;;  %918 = vmatprep.subr.bf16.mxu1 %v1200_v0  ;;  %v931_v47 = vpack.c.bf16 %v430_v46, %v429_v45  ;;  %v432_v49 = vld [vmem:[#allocation5 + $0x78] sm:$0xff]  ;;  %v515_v51 = vld [vmem:[#allocation7] sm:$0xff]  ;;  %v516_v52 = vld [vmem:[#allocation7 + $0x8] sm:$0xff]  ;;  %p1130_p13 = scmp.lt.s32.totalorder %s1452_s18, %s1128_s21  ;;  %p1131_p1 = scmp.lt.s32.totalorder %s1129_s22, %s1123_s9 }
  0x71   : > { %897 = vmatprep.subr.bf16.mxu0 %v1200_v0  ;;  %v934_v50 = vpack.c.bf16 %v432_v49, %v431_v48  ;;  %v517_v53 = vld [vmem:[#allocation7 + $0x10] sm:$0xff]  ;;  %v937_v54 = vpack.c.bf16 %v516_v52, %v515_v51  ;;  %v518_v55 = vld [vmem:[#allocation7 + $0x18] sm:$0xff]  ;;  %v519_v57 = vld [vmem:[#allocation7 + $0x20] sm:$0xff]  ;;  %p1126_p11 = pneg %p1125_p8 }
  0x72   : > { %v940_v56 = vpack.c.bf16 %v518_v55, %v517_v53  ;;  %v520_v58 = vld [vmem:[#allocation7 + $0x28] sm:$0xff]  ;;  %v725_v60 = vld [vmem:[%s1494_s2] ss:$0 sm:$0xff]  ;;  %v521_v6 = vld [vmem:[#allocation7 + $0x30] sm:$0xff]  ;;  %p1132_p6 = por %p1131_p1, %p1130_p13 }
  0x73   : > { %920 = vmatpush3.bf16.msra.mxu1 %v919_v24  ;;  %v943_v59 = vpack.c.bf16 %v520_v58, %v519_v57  ;;  %v522_v7 = vld [vmem:[#allocation7 + $0x38] sm:$0xff]  ;;  %v523_v9 = vld [vmem:[#allocation7 + $0x40] sm:$0xff]  ;;  %v524_v10 = vld [vmem:[#allocation7 + $0x48] sm:$0xff] }
  0x74   : > { %899 = vmatpush3.bf16.msra.mxu0 %v898_v21  ;;  %921 = vmatprep.subr.bf16.mxu1 %v1200_v0  ;;  %v946_v8 = vpack.c.bf16 %v522_v7, %v521_v6  ;;  %v949_v11 = vpack.c.bf16 %v524_v10, %v523_v9  ;;  %v525_v12 = vld [vmem:[#allocation7 + $0x50] sm:$0xff]  ;;  %v526_v13 = vld [vmem:[#allocation7 + $0x58] sm:$0xff]  ;;  %v527_v15 = vld [vmem:[#allocation7 + $0x60] sm:$0xff]  ;;  %p1133_p9 = pnand %p1132_p6, %p1126_p11 }
  0x75   : > { %900 = vmatprep.subr.bf16.mxu0 %v1200_v0  ;;  %v952_v14 = vpack.c.bf16 %v526_v13, %v525_v12  ;;  %v528_v16 = vld [vmem:[#allocation7 + $0x68] sm:$0xff]  ;;  %v529_v18 = vld [vmem:[#allocation7 + $0x70] sm:$0xff]  ;;  %v530_v19 = vld [vmem:[#allocation7 + $0x78] sm:$0xff] }
  0x76   : > { %v955_v17 = vpack.c.bf16 %v528_v16, %v527_v15  ;;  %v958_v20 = vpack.c.bf16 %v530_v19, %v529_v18  ;;  %v726_v21 = vld [vmem:[%s1496_s4] ss:$0 sm:$0xff] }
  0x77   : > { %923 = vmatpush3.bf16.msra.mxu1 %v922_v38 }
  0x78   : > { %902 = vmatpush3.bf16.msra.mxu0 %v901_v25  ;;  %924 = vmatprep.subr.bf16.mxu1 %v1200_v0 }
  0x79   : > { %903 = vmatprep.subr.bf16.mxu0 %v1200_v0 }
  0x7b   : > { %926 = vmatpush3.bf16.msra.mxu1 %v925_v41 }
  0x7c   : > { %905 = vmatpush3.bf16.msra.mxu0 %v904_v28  ;;  %927 = vmatprep.subr.bf16.mxu1 %v1200_v0 }
  0x7d   : > { %906 = vmatprep.subr.bf16.mxu0 %v1200_v0 }
  0x7f   : > { %929 = vmatpush3.bf16.msra.mxu1 %v928_v44 }
  0x80   : > { %908 = vmatpush3.bf16.msra.mxu0 %v907_v31  ;;  %930 = vmatprep.subr.bf16.mxu1 %v1200_v0 }
  0x81   : > { %909 = vmatprep.subr.bf16.mxu0 %v1200_v0 }
  0x83   : > { %932 = vmatpush3.bf16.msra.mxu1 %v931_v47 }
  0x84   : > { %911 = vmatpush3.bf16.msra.mxu0 %v910_v34  ;;  %933 = vmatprep.subr.bf16.mxu1 %v1200_v0 }
  0x85   : > { %936 = vmatprep.subr.bf16.mxu0 %v1200_v0 }
  0x87   : > { %816 = vmatmul.mubr.f32.vlgmr.msra.gmra.mrb[0].mxu0 %v318_v35  ;;  %935 = vmatpush3.bf16.msra.mxu1 %v934_v50 }
  0x88   : > { %885 = vmatprep.mubr.msk.f32.mxu0 %vm1201_vm0, %v1202_v1  ;;  %938 = vmatpush3.bf16.msra.mxu0 %v937_v54 }
  0x89   : > { %939 = vmatprep.subr.bf16.mxu0 %v1200_v0 }
  0x8c   : > { %941 = vmatpush3.bf16.msra.mxu0 %v940_v56 }
  0x8d   : > { %942 = vmatprep.subr.bf16.mxu0 %v1200_v0 }
  0x90   : > { %944 = vmatpush3.bf16.msra.mxu0 %v943_v59 }
  0x91   : > { %945 = vmatprep.subr.bf16.mxu0 %v1200_v0 }
  0x94   : > { %947 = vmatpush3.bf16.msra.mxu0 %v946_v8 }
  0x95   : > { %948 = vmatprep.subr.bf16.mxu0 %v1200_v0 }
  0x98   : > { %950 = vmatpush3.bf16.msra.mxu0 %v949_v11 }
  0x99   : > { %951 = vmatprep.subr.bf16.mxu0 %v1200_v0 }
  0x9c   : > { %953 = vmatpush3.bf16.msra.mxu0 %v952_v14 }
  0x9d   : > { %954 = vmatprep.subr.bf16.mxu0 %v1200_v0 }
  0xa0   : > { %956 = vmatpush3.bf16.msra.mxu0 %v955_v17 }
  0xa1   : > { %957 = vmatprep.subr.bf16.mxu0 %v1200_v0  ;;  %v727_v0 = vld [vmem:[%s1498_s6] ss:$0 sm:$0xff] }
  0xa4   : > { %959 = vmatpush3.bf16.msra.mxu0 %v958_v20 }
 0x15a   : > { %v408_v61 = vpop.f32.mrb[0].mxu0 }
 0x15b   : > { %v409_v62 = vadd.f32 %v725_v60, %v408_v61  ;;  %v817_v63 = vpop.f32.mrb[1].mxu0 }
 0x15d   : > { %v413_v1 = vmul.f32 0.70710677, %v409_v62  ;;  %v412_v3 = vmul.f32 0.5, %v409_v62 }
 0x15f   : > { %1035 = verf.f32 %v413_v1 }
 0x169   : > { %v1036_v2 = vpop.eup %1035 }
 0x16a   : > { %v415_v4 = vadd.f32 1.0, %v1036_v2 }
 0x16c   : > { %v416_v5 = vmul.f32 %v415_v4, %v412_v3 }
 0x16e   : > { %851 = vmatmul.mubr.f32.vlgmr.msra.gmra.mrb[0].mxu1 %v416_v5 }
 0x241   : > { %v506_v22 = vpop.f32.mrb[0].mxu1 }
 0x242   : > { %v507_v23 = vadd.f32 %v726_v21, %v506_v22  ;;  %v852_v24 = vpop.f32.mrb[1].mxu1 }
 0x244   : > { %v511_v25 = vmul.f32 0.70710677, %v507_v23  ;;  %v510_v27 = vmul.f32 0.5, %v507_v23 }
 0x246   : > { %1037 = verf.f32 %v511_v25 }
 0x250   : > { %v1038_v26 = vpop.eup %1037 }
 0x251   : > { %v513_v28 = vadd.f32 1.0, %v1038_v26 }
 0x253   : > { %v514_v29 = vmul.f32 %v513_v28, %v510_v27 }
 0x255   : > { %886 = vmatmul.mubr.f32.vlgmr.msra.gmra.mrb[2].mxu0 %v514_v29 }
 0x328   : > { %v604_v30 = vpop.f32.mrb[2].mxu0 }
 0x329   : > { %v605_v31 = vadd.f32 %v727_v0, %v604_v30  ;;  %v887_v32 = vpop.f32.mrb[3].mxu0 }
 0x32b   : > { %608 = vst [vmem:[%s313_s15] sm:$0xff] %v605_v31 }
 0x32c   : > { %1136 = shalt.err (!%p1133_p9)
}
 0x32d   : > { %s1137_s30 = scalar_lea.hbm %s1450_s16, 128  ;;  %s1141_s29 = scalar_lea.hbm %s1499_s7, 256 }
 0x32e   : > { %p1138_p2 = scmp.ne.s32.totalorder %s1450_s16, %s1137_s30  ;;  %p1142_p5 = scmp.lt.u32.totalorder %s1450_s16, %s1499_s7 }
 0x32f   : > { %p1143_p10 = scmp.lt.u32.totalorder %s1141_s29, %s1137_s30  ;;  %p1145_p4 = scmp.lt.u32.totalorder %s1137_s30, %s1450_s16 }
 0x330   : > { %p1139_p0 = pnand %p1138_p2, %p1519_p7 }
 0x331   : > { %p1144_p12 = por %p1143_p10, %p1142_p5 }
 0x332   : > { %p1140_p3 = pneg %p1139_p0 }
 0x333   : > { %p1146_p8 = por %p1145_p4, %p1144_p12 }
 0x335   : > { %p1147_p11 = pnand %p1146_p8, %p1140_p3 }
 0x337   : > { %1150 = shalt.err (!%p1147_p11)
}
 0x338   : > { %972 = dma.vmem_to_hbm [thread:$0]  (%p1519_p7), %s1452_s18, 128, %s1450_s16, %s610_s20  }
 0x339 PF: > { %p994_p13 = scmp.ge.s32.totalorder %s1193_s27, 2  ;;  %s635_s17 = sand.u32 1, %s1181_s24  }
 0x33a   : > { %p1520_p1 = scmp.ne.s32.totalorder %s1510_s12, 0  ;;  %s636_s19 = scalar_lea.sflag [#allocation4], %s635_s17 }
 0x33c   : > { %p985_p6 = pnand %p994_p13, %p1520_p1 }
 0x33e   : > { %1176 = dma.done.wait (!%p985_p6), %s636_s19, 128  }
 0x33f   : > { %1178 = vsyncadd (!%p985_p6), %s636_s19, 4294967168  ;;  %s1521_s27 = sld [smem:[#allocation13_spill]]  ;;  %s1522_s15 = sld [smem:[#allocation12_spill]] }
 0x340   : > { %s1523_s26 = sld [smem:[#allocation14_spill]]  ;;  %s1524_s24 = smov %s1185_s25 }
 0x345   : > { %p19_p9 = scmp.ge.s32.totalorder %s1521_s27, 4   ;;  %s1525_s25 = smov %s1522_s15 }
 0x347   :  { %21 = sbr.rel (!%p19_p9) target bundleno = 5 (0x5), region = 96 }
 0x34e   :  { %641 = vsyncpa [#allocation3], 1 }
 0x34f   :  { %643 = vsyncpa [#allocation3 + $0x1], 1 }
 0x350   :  { %644 = vsyncpa [#allocation6], 1 }
 0x351   :  { %645 = vsyncpa [#allocation4], 1 }
 0x352   :  { %647 = vsyncpa [#allocation4 + $0x1], 1 }

</bundles_post_ra>
